<compile_context>
chip_gen: v5e
topology: v5e:2x2
jax: 0.10.0
libtpu: 0.0.40
codegen_flags: <defaults>
</compile_context>

<pallas_src>
import functools

import jax
import jax.numpy as jnp
from jax.experimental import pallas as pl
from jax.experimental.pallas import tpu as pltpu


def _cdiv(a, b):
    return -(-a // b)


def _pick_tile(dim, requested, full_max, default_tile, granule):
    """Tile size for `dim`: full dim when small enough, else a granule multiple."""
    if requested is not None:
        t = max(1, min(int(requested), dim))
        if t < dim:
            t = max(granule, (t // granule) * granule)
        return t
    if dim <= full_max:
        return dim
    return default_tile


# --------------------------------------------------------------------------
# Kernel 1: global average pool as a row-tiled mean over the spatial axis.
#   x_ref:    (TR, THW) tile of the (B*C, H*W) input view
#   mean_ref: (TR, 1)   per-row mean (f32), resident across the hw grid axis
#   acc_ref:  (TR, 1)   f32 accumulator scratch
# Ragged spatial tails are zero-masked in-kernel (no HBM padding copy).
# --------------------------------------------------------------------------
def _pool_kernel(x_ref, mean_ref, acc_ref, *, inv_hw, hw, thw, mask_tail):
    j = pl.program_id(1)

    @pl.when(j == 0)
    def _init():
        acc_ref[...] = jnp.zeros_like(acc_ref)

    x = x_ref[...].astype(jnp.float32)
    if mask_tail:
        col = jax.lax.broadcasted_iota(jnp.int32, x.shape, 1) + j * thw
        x = jnp.where(col < hw, x, 0.0)
    acc_ref[...] += jnp.sum(x, axis=-1, keepdims=True)

    @pl.when(j == pl.num_programs(1) - 1)
    def _finalize():
        mean_ref[...] = (acc_ref[...] * inv_hw).astype(mean_ref.dtype)


# --------------------------------------------------------------------------
# Kernel 2: fused 1x1 conv (channel mix) + broadcast "bilinear" upsample.
#   mean_ref: (1, C, 1)    pooled means for batch b (f32)
#   w_ref:    (TC, C)      conv weight tile (Cout tile, Cin) (f32)
#   b_ref:    (TC, 1)      bias column tile (f32)
#   o_ref:    (1, TC, THW) lane-dense output tile
#   y_ref:    (TC, 1)      f32 scratch holding the mixed value for (b, ci)
# The mix runs once per (b, ci) at the first spatial step; every spatial step
# is then a pure lane broadcast + store.
# --------------------------------------------------------------------------
def _mix_broadcast_kernel(mean_ref, w_ref, b_ref, o_ref, y_ref):
    j = pl.program_id(2)

    @pl.when(j == 0)
    def _mix():
        y_ref[...] = (
            jnp.dot(w_ref[...], mean_ref[0], preferred_element_type=jnp.float32)
            + b_ref[...]
        )

    tc, thw = o_ref.shape[1], o_ref.shape[2]
    o_ref[...] = jnp.broadcast_to(
        y_ref[...].reshape(1, tc, 1), (1, tc, thw)
    ).astype(o_ref.dtype)


def image_pool(x, weight, bias, *,
               hw_tile=None, row_tile=None, c_tile=None, out_hw_tile=None):
    """x: (B, C, H, W); weight: (C, C, 1, 1); bias: (C,) -> (B, C, H, W)."""
    B, C, H, W = x.shape
    HW = H * W
    BC = B * C
    itemsize = jnp.dtype(x.dtype).itemsize
    blk_budget = 1 << 20  # ~1 MiB per block (double-buffered by Pallas)

    # ---- pass 1: global average pool over the flattened (B*C, H*W) view ----
    thw = _pick_tile(HW, hw_tile, 8192, 2048, 128)
    nhw = _cdiv(HW, thw)
    mask_tail = (HW % thw) != 0

    row_cap = max(8, min(1024, (blk_budget // max(1, thw * itemsize)) // 8 * 8))
    tr = _pick_tile(BC, row_tile, row_cap, row_cap, 8)
    nr = _cdiv(BC, tr)

    x2 = x.reshape(BC, HW)  # contiguous view: no HBM copy, no padding
    means = pl.pallas_call(
        functools.partial(_pool_kernel, inv_hw=1.0 / HW, hw=HW, thw=thw,
                          mask_tail=mask_tail),
        out_shape=jax.ShapeDtypeStruct((BC, 1), jnp.float32),
        grid=(nr, nhw),
        in_specs=[pl.BlockSpec((tr, thw), lambda i, j: (i, j))],
        out_specs=pl.BlockSpec((tr, 1), lambda i, j: (i, 0)),
        scratch_shapes=[pltpu.VMEM((tr, 1), jnp.float32)],
        compiler_params=pltpu.CompilerParams(
            dimension_semantics=("parallel", "arbitrary")),
    )(x2)

    # ---- pass 2: fused channel mix + broadcast upsample ---------------------
    # Bilinear resize of a 1x1 map (align_corners=False) == broadcast.
    w2 = weight.reshape(C, C).astype(jnp.float32)   # (Cout, Cin), no transpose
    bcol = bias.reshape(C, 1).astype(jnp.float32)
    mean_b = means.reshape(B, C, 1)                  # tiny, stays f32

    tc = _pick_tile(C, c_tile, 1024, 256, 8)
    nc = _cdiv(C, tc)
    thw_o_cap = max(128, (blk_budget // max(1, tc * itemsize)) // 128 * 128)
    thw_o = _pick_tile(HW, out_hw_tile, thw_o_cap, thw_o_cap, 128)
    nhw_o = _cdiv(HW, thw_o)

    out3 = pl.pallas_call(
        _mix_broadcast_kernel,
        out_shape=jax.ShapeDtypeStruct((B, C, HW), x.dtype),
        grid=(B, nc, nhw_o),
        in_specs=[
            pl.BlockSpec((1, C, 1), lambda b, ci, j: (b, 0, 0)),
            pl.BlockSpec((tc, C), lambda b, ci, j: (ci, 0)),
            pl.BlockSpec((tc, 1), lambda b, ci, j: (ci, 0)),
        ],
        out_specs=pl.BlockSpec((1, tc, thw_o), lambda b, ci, j: (b, ci, j)),
        scratch_shapes=[pltpu.VMEM((tc, 1), jnp.float32)],
        compiler_params=pltpu.CompilerParams(
            dimension_semantics=("parallel", "parallel", "arbitrary")),
    )(mean_b, w2, bcol)

    return out3.reshape(B, C, H, W)


def _reference(x, weight, bias):
    # Pure-JAX reference of the PyTorch forward.
    mean = jnp.mean(x.astype(jnp.float32), axis=(2, 3))            # (B, C)
    w2 = weight.reshape(weight.shape[0], weight.shape[1]).astype(jnp.float32)
    yv = mean @ w2.T + bias.astype(jnp.float32)
    yv = yv.astype(x.dtype)
    return jnp.broadcast_to(yv[:, :, None, None], x.shape)


if __name__ == "__main__":
    key = jax.random.PRNGKey(0)
    kx, kw, kb = jax.random.split(key, 3)

    # Primary: nominal small shape, fully aligned fast path.
    B, C, H, W = 2, 4, 16, 16
    x = jax.random.normal(kx, (B, C, H, W), dtype=jnp.float32)
    weight = jax.random.normal(kw, (C, C, 1, 1), dtype=jnp.float32) * 0.1
    bias = jax.random.normal(kb, (C,), dtype=jnp.float32) * 0.1
    out = jax.block_until_ready(image_pool(x, weight, bias))
    ref = _reference(x, weight, bias)
    assert out.shape == (B, C, H, W)
    assert jnp.allclose(out, ref, atol=1e-5, rtol=1e-5), "mismatch (aligned)"

    # Unaligned dims (C=5, H*W=49): full-dim blocks, still no padding anywhere.
    kx2, kw2, kb2 = jax.random.split(jax.random.PRNGKey(1), 3)
    xb = jax.random.normal(kx2, (2, 5, 7, 7), dtype=jnp.float32)
    wb = jax.random.normal(kw2, (5, 5, 1, 1), dtype=jnp.float32) * 0.1
    bb = jax.random.normal(kb2, (5,), dtype=jnp.float32) * 0.1
    outb = jax.block_until_ready(image_pool(xb, wb, bb))
    refb = _reference(xb, wb, bb)
    assert jnp.allclose(outb, refb, atol=1e-5, rtol=1e-5), "mismatch (unaligned)"

    # Forced small tiles: exercises ragged spatial tail masking, partial
    # row / cout boundary blocks and the tiled broadcast path.
    kx3, kw3, kb3 = jax.random.split(jax.random.PRNGKey(2), 3)
    xc = jax.random.normal(kx3, (2, 12, 20, 19), dtype=jnp.float32)
    wc = jax.random.normal(kw3, (12, 12, 1, 1), dtype=jnp.float32) * 0.1
    bc = jax.random.normal(kb3, (12,), dtype=jnp.float32) * 0.1
    outc = jax.block_until_ready(
        image_pool(xc, wc, bc, hw_tile=128, row_tile=16, c_tile=8, out_hw_tile=128))
    refc = _reference(xc, wc, bc)
    assert jnp.allclose(outc, refc, atol=1e-5, rtol=1e-5), "mismatch (tiled/ragged)"

    # bf16 I/O path (f32 accumulation + mix inside).
    xd = x.astype(jnp.bfloat16)
    outd = jax.block_until_ready(image_pool(xd, weight, bias))
    refd = _reference(xd, weight, bias)
    assert outd.dtype == jnp.bfloat16
    assert jnp.allclose(outd.astype(jnp.float32), refd.astype(jnp.float32),
                        atol=1e-2, rtol=1e-2), "mismatch (bf16)"

    print("KERNEL_OK")
</pallas_src>

<mosaic_0001>
module attributes {stable_mosaic.version = 11 : i64} {
  func.func @_pool_kernel(%arg0: i32, %arg1: i32, %arg2: memref<8x256xf32, #tpu.memory_space<vmem>>, %arg3: memref<8x1xf32, #tpu.memory_space<vmem>>, %arg4: memref<8x1xf32, #tpu.memory_space<vmem>>) attributes {dimension_semantics = [#tpu.dimension_semantics<parallel>, #tpu.dimension_semantics<arbitrary>], iteration_bounds = array<i64: 1, 1>, scalar_prefetch = 0 : i64, scratch_operands = 1 : i64, tpu.core_type = #tpu.core_type<tc>, window_params = [{transform_indices = @transform_0, window_bounds = array<i64: 8, 256>}, {transform_indices = @transform_1, window_bounds = array<i64: 8, 1>}]} {
    %c0_i32 = arith.constant 0 : i32
    %0 = arith.cmpi eq, %arg1, %c0_i32 : i32
    %1 = arith.extui %0 : i1 to i32
    %c0_i32_0 = arith.constant 0 : i32
    %2 = arith.cmpi ne, %1, %c0_i32_0 : i32
    scf.if %2 {
      %cst_8 = arith.constant 0.000000e+00 : f32
      %12 = vector.broadcast %cst_8 : f32 to vector<8x1xf32>
      %c0_9 = arith.constant 0 : index
      %c0_10 = arith.constant 0 : index
      %13 = vector.load %arg4[%c0_9, %c0_10] : memref<8x1xf32, #tpu.memory_space<vmem>>, vector<8x1xf32>
      tpu.vector_store %arg4[%c0_9, %c0_10], %12 {strides = array<i32>} : memref<8x1xf32, #tpu.memory_space<vmem>>, vector<8x1xf32>,
    } else {
    }
    %c0 = arith.constant 0 : index
    %c0_1 = arith.constant 0 : index
    %3 = vector.load %arg2[%c0, %c0_1] : memref<8x256xf32, #tpu.memory_space<vmem>>, vector<8x256xf32>
    %c0_2 = arith.constant 0 : index
    %c0_3 = arith.constant 0 : index
    %4 = vector.load %arg4[%c0_2, %c0_3] : memref<8x1xf32, #tpu.memory_space<vmem>>, vector<8x1xf32>
    %cst = arith.constant dense<0.000000e+00> : vector<8xf32>
    %5 = vector.multi_reduction <add>, %3, %cst [1] : vector<8x256xf32> to vector<8xf32>
    %6 = vector.shape_cast %5 : vector<8xf32> to vector<8x1xf32>
    %7 = arith.addf %4, %6 : vector<8x1xf32>
    %c0_4 = arith.constant 0 : index
    %c0_5 = arith.constant 0 : index
    %8 = vector.load %arg4[%c0_4, %c0_5] : memref<8x1xf32, #tpu.memory_space<vmem>>, vector<8x1xf32>
    tpu.vector_store %arg4[%c0_4, %c0_5], %7 {strides = array<i32>} : memref<8x1xf32, #tpu.memory_space<vmem>>, vector<8x1xf32>,
    %c0_i32_6 = arith.constant 0 : i32
    %9 = arith.cmpi eq, %arg1, %c0_i32_6 : i32
    %10 = arith.extui %9 : i1 to i32
    %c0_i32_7 = arith.constant 0 : i32
    %11 = arith.cmpi ne, %10, %c0_i32_7 : i32
    scf.if %11 {
      %c0_8 = arith.constant 0 : index
      %c0_9 = arith.constant 0 : index
      %12 = vector.load %arg4[%c0_8, %c0_9] : memref<8x1xf32, #tpu.memory_space<vmem>>, vector<8x1xf32>
      %cst_10 = arith.constant 3.906250e-03 : f32
      %13 = vector.broadcast %cst_10 : f32 to vector<8x1xf32>
      %14 = arith.mulf %12, %13 : vector<8x1xf32>
      %c0_11 = arith.constant 0 : index
      %c0_12 = arith.constant 0 : index
      %15 = vector.load %arg3[%c0_11, %c0_12] : memref<8x1xf32, #tpu.memory_space<vmem>>, vector<8x1xf32>
      tpu.vector_store %arg3[%c0_11, %c0_12], %14 {strides = array<i32>} : memref<8x1xf32, #tpu.memory_space<vmem>>, vector<8x1xf32>,
    } else {
    }
    return
  }
  func.func @transform_0(%arg0: i32, %arg1: i32) -> (i32, i32) {
    %c0_i32 = arith.constant 0 : i32
    return %arg0, %arg1 : i32, i32
  }
  func.func @transform_1(%arg0: i32, %arg1: i32) -> (i32, i32) {
    %c0_i32 = arith.constant 0 : i32
    %c0_i32_0 = arith.constant 0 : i32
    return %arg0, %c0_i32 : i32, i32
  }
}

</mosaic_0001>

<bundles_post_ra>
// kernel: tpu_custom_call.1
= control target key start
LH: loop header
LB: loop body
LE: loop exit
PB: predicated region body
PF: predicated region fallthrough
CT: control target
= control target key end

     0   :  { %6 = vsyncpa [#allocation4], 0  ;;  %s76_s9 = smov [#allocation3]   ;;  %s94_s0 = inlined_call_operand.hbm [shape: f32[8,256], index: 0, kind: input, shape index: {}]   ;;  %s95_s1 = inlined_call_operand.vmem [shape: f32[8,1], index: 1, kind: output, shape index: {}]  }
   0x1   :  { %s12_s8 = sshll.u32 %s94_s0, 4  ;;  %s14_s10 = sshll.u32 %s76_s9, 4  ;;  %s13_s8 = int_to_ptr.hbm [resolvable:$true] %s12_s8  ;;  %s15_s10 = int_to_ptr.vmem [resolvable:$true] %s14_s10 }
   0x2   :  { %17 = dma.hbm_to_vmem [thread:$0]  %s13_s8, 256, %s15_s10, [#allocation4]  }
   0x3   :  { %74 = dma.done.wait [#allocation4], 256  }
   0x4   :  { %75 = vsyncadd [#allocation4], 4294967040  ;;  %vm26_vm0 = vcmask 7168   ;;  %v77_v0 = vmov 0.0   ;;  %v28_v1 = vld [vmem:[#allocation3] sm:$0xff]  ;;  %v29_v2 = vld [vmem:[#allocation3 + $0x8] sm:$0xff] }
   0x5   :  { %27 = vst.msk [vmem:[#allocation2] sm:$0xff] %vm26_vm0, %v77_v0  ;;  %v31_v3 = vadd.f32 %v29_v2, %v28_v1 }
   0x7   :  { %32 = vadd.xlane.f32.xlu0 %v31_v3 }
   0xc   :  { %v30_v4 = vld [vmem:[#allocation2] sm:$0xff] }
  0x7a   :  { %v33_v5 = vpop.xlane.xlu0 %32 }
  0x7b   :  { %v34_v6 = vadd.f32 %v33_v5, %v30_v4 }
  0x7d   :  { %36 = vst.msk [vmem:[#allocation2] sm:$0xff] %vm26_vm0, %v34_v6 }
  0x84   :  { %v40_v7 = vld [vmem:[#allocation2] sm:$0xff] }
  0x85   :  { %v41_v8 = vmul.f32 0.00390625, %v40_v7 }
  0x87   :  { %42 = vst.msk [vmem:[%s95_s1] sm:$0xff] %vm26_vm0, %v41_v8 }
  0x88   :  { %47 = vsyncpa [#allocation4], 1 }

</bundles_post_ra>
